<compile_context>
chip_gen: v5e
topology: v5e:2x2
jax: 0.10.0
libtpu: 0.0.40
codegen_flags: <defaults>
</compile_context>

<pallas_src>
import functools

import jax
import jax.numpy as jnp
from jax.experimental import pallas as pl
from jax.experimental.pallas import tpu as pltpu

_LANE = 128
_SUBLANE = 8
_MIB = 1024 * 1024


def _round_up(n, m):
    return (n + m - 1) // m * m


def _softplus(x):
    # Branch-free, overflow-safe softplus (== torch Softplus(beta=1) to <1e-8 in f32).
    return jnp.maximum(x, 0.0) + jnp.log1p(jnp.exp(-jnp.abs(x)))


def _mlp_kernel(x_ref, w1_ref, b1_ref, w2_ref, b2_ref, w3_ref, b3_ref, o_ref,
                *, epilogue_dtype):
    ep = epilogue_dtype
    # Layer 1: bf16 MXU operands, f32 accumulation.
    x = x_ref[...].astype(jnp.bfloat16)
    h = jnp.dot(x, w1_ref[...], preferred_element_type=jnp.float32)
    h = _softplus(h.astype(ep) + b1_ref[...].astype(ep))
    # Layer 2.
    h = jnp.dot(h.astype(jnp.bfloat16), w2_ref[...],
                preferred_element_type=jnp.float32)
    h = _softplus(h.astype(ep) + b2_ref[...].astype(ep))
    # Layer 3 (no activation); keep the final bias add in f32.
    out = jnp.dot(h.astype(jnp.bfloat16), w3_ref[...],
                  preferred_element_type=jnp.float32) + b3_ref[...]
    o_ref[...] = out.astype(o_ref.dtype)


def _vmem_limit_bytes():
    cap = 64 * _MIB  # conservative default (v7x per-TC VMEM)
    try:
        info = pltpu.get_tpu_info()
        cap_attr = getattr(info, "vmem_capacity_bytes", None)
        if cap_attr:
            cap = int(cap_attr)
    except Exception:
        pass
    # Leave headroom for Mosaic internal scratch; never ask for more than 96 MiB.
    return max(32 * _MIB, min(cap - 8 * _MIB, 96 * _MIB))


def _epilogue_dtype_name():
    try:
        kind = jax.devices()[0].device_kind.lower()
    except Exception:
        kind = ""
    # bf16 VPU/EUP path exists on v6e/v7x; keep f32 elsewhere (v5e has none).
    if ("v6" in kind) or ("v7" in kind) or ("7x" in kind):
        return "bfloat16"
    return "float32"


def _choose_block_b(batch, block_b):
    b_al = _round_up(batch, _SUBLANE)
    bb = min(block_b, b_al)
    if b_al >= 512:
        # Ensure >=2 grid steps so a second TensorCore (v7x megacore) gets work.
        bb = min(bb, _round_up(-(-b_al // 2), 256))
    if bb >= 256:
        bb = (bb // 256) * 256          # fill 256x256 MXUs on v6e/v7x
    else:
        bb = _round_up(bb, _SUBLANE)    # small batch: one sublane-aligned tile
    return bb


@functools.partial(
    jax.jit,
    static_argnames=("block_b", "out_size", "single_buffer_weights",
                     "epilogue_dtype"))
def _forward(x, w1, b1, w2, b2, w3, b3, *, block_b, out_size,
             single_buffer_weights, epilogue_dtype):
    B, in_size = x.shape
    hid_p = w1.shape[1]
    out_p = w3.shape[1]

    bb = _choose_block_b(B, block_b)
    b_p = _round_up(B, bb)
    if b_p != B:
        x = jnp.pad(x, ((0, b_p - B), (0, 0)))   # batch pad only; no feature pad

    if single_buffer_weights:
        def wspec(shape):
            return pl.BlockSpec(shape, lambda i: (0, 0),
                                pipeline_mode=pl.Buffered(1))
    else:
        def wspec(shape):
            return pl.BlockSpec(shape, lambda i: (0, 0))

    grid = (b_p // bb,)
    kernel = functools.partial(_mlp_kernel,
                               epilogue_dtype=jnp.dtype(epilogue_dtype))

    out_padded = pl.pallas_call(
        kernel,
        out_shape=jax.ShapeDtypeStruct((b_p, out_p), x.dtype),
        grid_spec=pltpu.PrefetchScalarGridSpec(
            num_scalar_prefetch=0,
            grid=grid,
            in_specs=[
                pl.BlockSpec((bb, in_size), lambda i: (i, 0)),  # streamed x
                wspec((in_size, hid_p)),   # w1 (constant across grid)
                wspec((1, hid_p)),         # b1
                wspec((hid_p, hid_p)),     # w2
                wspec((1, hid_p)),         # b2
                wspec((hid_p, out_p)),     # w3
                wspec((1, out_p)),         # b3
            ],
            out_specs=pl.BlockSpec((bb, out_p), lambda i: (i, 0)),
        ),
        compiler_params=pltpu.CompilerParams(
            dimension_semantics=("parallel",),
            vmem_limit_bytes=_vmem_limit_bytes(),
        ),
    )(x, w1, b1, w2, b2, w3, b3)

    if b_p != B or out_p != out_size:
        return out_padded[:B, :out_size]
    return out_padded


def prepare_params(params, weight_dtype=jnp.bfloat16):
    """One-time pad/cast of the weights (amortized across forward calls).

    Weights are [in, out]; hidden/out feature dims are lane-padded to 128.
    Padded bias lanes MUST stay zero (jnp.pad guarantees this) so padded
    hidden lanes (softplus(0)=log 2) hit zero weight rows downstream.
    """
    w1, b1, w2, b2, w3, b3 = params
    hidden = w1.shape[1]
    out_size = w3.shape[1]
    hid_p = _round_up(hidden, _LANE)
    out_p = _round_up(out_size, _LANE)

    def pad_cols(a, cols, dtype):
        a = a.astype(dtype)
        return jnp.pad(a, ((0, 0), (0, cols - a.shape[1])))

    def pad_rc(a, rows, cols, dtype):
        a = a.astype(dtype)
        return jnp.pad(a, ((0, rows - a.shape[0]), (0, cols - a.shape[1])))

    w1p = pad_cols(w1, hid_p, weight_dtype)          # (in,    hid_p)
    b1p = pad_cols(b1, hid_p, jnp.float32)           # (1,     hid_p)
    w2p = pad_rc(w2, hid_p, hid_p, weight_dtype)     # (hid_p, hid_p)
    b2p = pad_cols(b2, hid_p, jnp.float32)           # (1,     hid_p)
    w3p = pad_rc(w3, hid_p, out_p, weight_dtype)     # (hid_p, out_p)
    b3p = pad_cols(b3, out_p, jnp.float32)           # (1,     out_p)
    prepped = {"params": (w1p, b1p, w2p, b2p, w3p, b3p), "out_size": out_size}
    jax.block_until_ready(prepped["params"])
    return prepped


def netg_wgan_forward(x, prepped, *, block_b=1024):
    """x: [B, inputSize] f32; prepped from prepare_params(...)."""
    w1, b1, w2, b2, w3, b3 = prepped["params"]
    kwargs = dict(block_b=block_b, out_size=prepped["out_size"],
                  epilogue_dtype=_epilogue_dtype_name())
    try:
        return _forward(x, w1, b1, w2, b2, w3, b3,
                        single_buffer_weights=True, **kwargs)
    except Exception:
        # Fallback if this jax version rejects pipeline_mode=pl.Buffered(1).
        return _forward(x, w1, b1, w2, b2, w3, b3,
                        single_buffer_weights=False, **kwargs)


def init_params(key, input_size, hidden_size, output_size, dtype=jnp.float32):
    """nn.Linear-style init U(-1/sqrt(fan_in), 1/sqrt(fan_in)); weights [in, out]."""
    ks = jax.random.split(key, 6)

    def lin(kw, kb, fan_in, fan_out):
        bound = 1.0 / jnp.sqrt(jnp.float32(fan_in))
        w = jax.random.uniform(kw, (fan_in, fan_out), dtype, -bound, bound)
        b = jax.random.uniform(kb, (1, fan_out), dtype, -bound, bound)
        return w, b

    w1, b1 = lin(ks[0], ks[1], input_size, hidden_size)
    w2, b2 = lin(ks[2], ks[3], hidden_size, hidden_size)
    w3, b3 = lin(ks[4], ks[5], hidden_size, output_size)
    return w1, b1, w2, b2, w3, b3


def reference_forward(x, w1, b1, w2, b2, w3, b3):
    h = _softplus(x @ w1 + b1)
    h = _softplus(h @ w2 + b2)
    return h @ w3 + b3


if __name__ == "__main__":
    # Small shapes consistent with the module: noise vector -> hidden -> output.
    batch, input_size, hidden_size, output_size = 8, 32, 64, 16

    key = jax.random.PRNGKey(0)
    kx, kp = jax.random.split(key)
    x = jax.random.normal(kx, (batch, input_size), dtype=jnp.float32)
    params = init_params(kp, input_size, hidden_size, output_size)

    prepped = prepare_params(params)          # one-time pad/cast of weights
    out = netg_wgan_forward(x, prepped)
    out = jax.block_until_ready(out)

    ref = reference_forward(x, *params)
    assert out.shape == (batch, output_size), out.shape
    # bf16 MXU operands (+ possibly bf16 epilogue) vs a pure-f32 reference.
    assert jnp.allclose(out, ref, atol=2e-2, rtol=2e-2), "mismatch vs reference"

    print("KERNEL_OK")
</pallas_src>

<mosaic_0001>
module attributes {stable_mosaic.version = 11 : i64} {
  func.func @_mlp_kernel(%arg0: i32, %arg1: memref<8x32xf32, #tpu.memory_space<vmem>>, %arg2: memref<32x128xbf16, #tpu.memory_space<vmem>>, %arg3: memref<1x128xf32, #tpu.memory_space<vmem>>, %arg4: memref<128x128xbf16, #tpu.memory_space<vmem>>, %arg5: memref<1x128xf32, #tpu.memory_space<vmem>>, %arg6: memref<128x128xbf16, #tpu.memory_space<vmem>>, %arg7: memref<1x128xf32, #tpu.memory_space<vmem>>, %arg8: memref<8x128xf32, #tpu.memory_space<vmem>>) attributes {dimension_semantics = [#tpu.dimension_semantics<parallel>], iteration_bounds = array<i64: 1>, scalar_prefetch = 0 : i64, scratch_operands = 0 : i64, tpu.core_type = #tpu.core_type<tc>, window_params = [{transform_indices = @transform_0, window_bounds = array<i64: 8, 32>}, {pipeline_mode = #tpu.pipeline_mode<synchronous>, transform_indices = @transform_1, window_bounds = array<i64: 32, 128>}, {pipeline_mode = #tpu.pipeline_mode<synchronous>, transform_indices = @transform_2, window_bounds = array<i64: 1, 128>}, {pipeline_mode = #tpu.pipeline_mode<synchronous>, transform_indices = @transform_3, window_bounds = array<i64: 128, 128>}, {pipeline_mode = #tpu.pipeline_mode<synchronous>, transform_indices = @transform_4, window_bounds = array<i64: 1, 128>}, {pipeline_mode = #tpu.pipeline_mode<synchronous>, transform_indices = @transform_5, window_bounds = array<i64: 128, 128>}, {pipeline_mode = #tpu.pipeline_mode<synchronous>, transform_indices = @transform_6, window_bounds = array<i64: 1, 128>}, {transform_indices = @transform_7, window_bounds = array<i64: 8, 128>}]} {
    %c0 = arith.constant 0 : index
    %c0_0 = arith.constant 0 : index
    %0 = vector.load %arg1[%c0, %c0_0] : memref<8x32xf32, #tpu.memory_space<vmem>>, vector<8x32xf32>
    %1 = arith.truncf %0 : vector<8x32xf32> to vector<8x32xbf16>
    %c0_1 = arith.constant 0 : index
    %c0_2 = arith.constant 0 : index
    %2 = vector.load %arg2[%c0_1, %c0_2] : memref<32x128xbf16, #tpu.memory_space<vmem>>, vector<32x128xbf16>
    %cst = arith.constant dense<0.000000e+00> : vector<8x128xf32>
    %3 = tpu.matmul %1, %2, %cst {dimension_numbers = #tpu.dot_dimension_numbers<[1], [0], [0], [1], [0, 0, 1, 1], [], []>} : vector<8x32xbf16>, vector<32x128xbf16>, vector<8x128xf32> -> vector<8x128xf32>
    %c0_3 = arith.constant 0 : index
    %c0_4 = arith.constant 0 : index
    %4 = vector.load %arg3[%c0_3, %c0_4] : memref<1x128xf32, #tpu.memory_space<vmem>>, vector<1x128xf32>
    %5 = vector.broadcast %4 : vector<1x128xf32> to vector<8x128xf32>
    %6 = arith.addf %3, %5 : vector<8x128xf32>
    %cst_5 = arith.constant 0.000000e+00 : f32
    %7 = vector.broadcast %cst_5 : f32 to vector<8x128xf32>
    %8 = arith.maximumf %6, %7 : vector<8x128xf32>
    %9 = math.absf %6 : vector<8x128xf32>
    %cst_6 = arith.constant 0.000000e+00 : f32
    %10 = vector.broadcast %cst_6 : f32 to vector<8x128xf32>
    %11 = arith.subf %10, %9 : vector<8x128xf32>
    %12 = math.exp %11 : vector<8x128xf32>
    %13 = math.log1p %12 : vector<8x128xf32>
    %14 = arith.addf %8, %13 : vector<8x128xf32>
    %15 = arith.truncf %14 : vector<8x128xf32> to vector<8x128xbf16>
    %c0_7 = arith.constant 0 : index
    %c0_8 = arith.constant 0 : index
    %16 = vector.load %arg4[%c0_7, %c0_8] : memref<128x128xbf16, #tpu.memory_space<vmem>>, vector<128x128xbf16>
    %cst_9 = arith.constant dense<0.000000e+00> : vector<8x128xf32>
    %17 = tpu.matmul %15, %16, %cst_9 {dimension_numbers = #tpu.dot_dimension_numbers<[1], [0], [0], [1], [0, 0, 1, 1], [], []>} : vector<8x128xbf16>, vector<128x128xbf16>, vector<8x128xf32> -> vector<8x128xf32>
    %c0_10 = arith.constant 0 : index
    %c0_11 = arith.constant 0 : index
    %18 = vector.load %arg5[%c0_10, %c0_11] : memref<1x128xf32, #tpu.memory_space<vmem>>, vector<1x128xf32>
    %19 = vector.broadcast %18 : vector<1x128xf32> to vector<8x128xf32>
    %20 = arith.addf %17, %19 : vector<8x128xf32>
    %cst_12 = arith.constant 0.000000e+00 : f32
    %21 = vector.broadcast %cst_12 : f32 to vector<8x128xf32>
    %22 = arith.maximumf %20, %21 : vector<8x128xf32>
    %23 = math.absf %20 : vector<8x128xf32>
    %cst_13 = arith.constant 0.000000e+00 : f32
    %24 = vector.broadcast %cst_13 : f32 to vector<8x128xf32>
    %25 = arith.subf %24, %23 : vector<8x128xf32>
    %26 = math.exp %25 : vector<8x128xf32>
    %27 = math.log1p %26 : vector<8x128xf32>
    %28 = arith.addf %22, %27 : vector<8x128xf32>
    %29 = arith.truncf %28 : vector<8x128xf32> to vector<8x128xbf16>
    %c0_14 = arith.constant 0 : index
    %c0_15 = arith.constant 0 : index
    %30 = vector.load %arg6[%c0_14, %c0_15] : memref<128x128xbf16, #tpu.memory_space<vmem>>, vector<128x128xbf16>
    %cst_16 = arith.constant dense<0.000000e+00> : vector<8x128xf32>
    %31 = tpu.matmul %29, %30, %cst_16 {dimension_numbers = #tpu.dot_dimension_numbers<[1], [0], [0], [1], [0, 0, 1, 1], [], []>} : vector<8x128xbf16>, vector<128x128xbf16>, vector<8x128xf32> -> vector<8x128xf32>
    %c0_17 = arith.constant 0 : index
    %c0_18 = arith.constant 0 : index
    %32 = vector.load %arg7[%c0_17, %c0_18] : memref<1x128xf32, #tpu.memory_space<vmem>>, vector<1x128xf32>
    %33 = vector.broadcast %32 : vector<1x128xf32> to vector<8x128xf32>
    %34 = arith.addf %31, %33 : vector<8x128xf32>
    %c0_19 = arith.constant 0 : index
    %c0_20 = arith.constant 0 : index
    %35 = vector.load %arg8[%c0_19, %c0_20] : memref<8x128xf32, #tpu.memory_space<vmem>>, vector<8x128xf32>
    tpu.vector_store %arg8[%c0_19, %c0_20], %34 {strides = array<i32>} : memref<8x128xf32, #tpu.memory_space<vmem>>, vector<8x128xf32>,
    return
  }
  func.func @transform_0(%arg0: i32) -> (i32, i32) {
    %c0_i32 = arith.constant 0 : i32
    %c0_i32_0 = arith.constant 0 : i32
    return %arg0, %c0_i32 : i32, i32
  }
  func.func @transform_1(%arg0: i32) -> (i32, i32) {
    %c0_i32 = arith.constant 0 : i32
    %c0_i32_0 = arith.constant 0 : i32
    %c0_i32_1 = arith.constant 0 : i32
    return %c0_i32, %c0_i32_0 : i32, i32
  }
  func.func @transform_2(%arg0: i32) -> (i32, i32) {
    %c0_i32 = arith.constant 0 : i32
    %c0_i32_0 = arith.constant 0 : i32
    %c0_i32_1 = arith.constant 0 : i32
    return %c0_i32, %c0_i32_0 : i32, i32
  }
  func.func @transform_3(%arg0: i32) -> (i32, i32) {
    %c0_i32 = arith.constant 0 : i32
    %c0_i32_0 = arith.constant 0 : i32
    %c0_i32_1 = arith.constant 0 : i32
    return %c0_i32, %c0_i32_0 : i32, i32
  }
  func.func @transform_4(%arg0: i32) -> (i32, i32) {
    %c0_i32 = arith.constant 0 : i32
    %c0_i32_0 = arith.constant 0 : i32
    %c0_i32_1 = arith.constant 0 : i32
    return %c0_i32, %c0_i32_0 : i32, i32
  }
  func.func @transform_5(%arg0: i32) -> (i32, i32) {
    %c0_i32 = arith.constant 0 : i32
    %c0_i32_0 = arith.constant 0 : i32
    %c0_i32_1 = arith.constant 0 : i32
    return %c0_i32, %c0_i32_0 : i32, i32
  }
  func.func @transform_6(%arg0: i32) -> (i32, i32) {
    %c0_i32 = arith.constant 0 : i32
    %c0_i32_0 = arith.constant 0 : i32
    %c0_i32_1 = arith.constant 0 : i32
    return %c0_i32, %c0_i32_0 : i32, i32
  }
  func.func @transform_7(%arg0: i32) -> (i32, i32) {
    %c0_i32 = arith.constant 0 : i32
    %c0_i32_0 = arith.constant 0 : i32
    return %arg0, %c0_i32 : i32, i32
  }
}

module attributes {stable_mosaic.version = 11 : i64} {
  func.func @_mlp_kernel(%arg0: i32, %arg1: memref<8x32xf32, #tpu.memory_space<vmem>>, %arg2: memref<32x128xbf16, #tpu.memory_space<vmem>>, %arg3: memref<1x128xf32, #tpu.memory_space<vmem>>, %arg4: memref<128x128xbf16, #tpu.memory_space<vmem>>, %arg5: memref<1x128xf32, #tpu.memory_space<vmem>>, %arg6: memref<128x128xbf16, #tpu.memory_space<vmem>>, %arg7: memref<1x128xf32, #tpu.memory_space<vmem>>, %arg8: memref<8x128xf32, #tpu.memory_space<vmem>>) attributes {dimension_semantics = [#tpu.dimension_semantics<parallel>], iteration_bounds = array<i64: 1>, scalar_prefetch = 0 : i64, scratch_operands = 0 : i64, tpu.core_type = #tpu.core_type<tc>, window_params = [{transform_indices = @transform_0, window_bounds = array<i64: 8, 32>}, {pipeline_mode = #tpu.pipeline_mode<synchronous>, transform_indices = @transform_1, window_bounds = array<i64: 32, 128>}, {pipeline_mode = #tpu.pipeline_mode<synchronous>, transform_indices = @transform_2, window_bounds = array<i64: 1, 128>}, {pipeline_mode = #tpu.pipeline_mode<synchronous>, transform_indices = @transform_3, window_bounds = array<i64: 128, 128>}, {pipeline_mode = #tpu.pipeline_mode<synchronous>, transform_indices = @transform_4, window_bounds = array<i64: 1, 128>}, {pipeline_mode = #tpu.pipeline_mode<synchronous>, transform_indices = @transform_5, window_bounds = array<i64: 128, 128>}, {pipeline_mode = #tpu.pipeline_mode<synchronous>, transform_indices = @transform_6, window_bounds = array<i64: 1, 128>}, {transform_indices = @transform_7, window_bounds = array<i64: 8, 128>}]} {
    %c0 = arith.constant 0 : index
    %c0_0 = arith.constant 0 : index
    %0 = vector.load %arg1[%c0, %c0_0] : memref<8x32xf32, #tpu.memory_space<vmem>>, vector<8x32xf32>
    %1 = arith.truncf %0 : vector<8x32xf32> to vector<8x32xbf16>
    %c0_1 = arith.constant 0 : index
    %c0_2 = arith.constant 0 : index
    %2 = vector.load %arg2[%c0_1, %c0_2] : memref<32x128xbf16, #tpu.memory_space<vmem>>, vector<32x128xbf16>
    %cst = arith.constant dense<0.000000e+00> : vector<8x128xf32>
    %3 = tpu.matmul %1, %2, %cst {dimension_numbers = #tpu.dot_dimension_numbers<[1], [0], [0], [1], [0, 0, 1, 1], [], []>} : vector<8x32xbf16>, vector<32x128xbf16>, vector<8x128xf32> -> vector<8x128xf32>
    %c0_3 = arith.constant 0 : index
    %c0_4 = arith.constant 0 : index
    %4 = vector.load %arg3[%c0_3, %c0_4] : memref<1x128xf32, #tpu.memory_space<vmem>>, vector<1x128xf32>
    %5 = vector.broadcast %4 : vector<1x128xf32> to vector<8x128xf32>
    %6 = arith.addf %3, %5 : vector<8x128xf32>
    %cst_5 = arith.constant 0.000000e+00 : f32
    %7 = vector.broadcast %cst_5 : f32 to vector<8x128xf32>
    %8 = arith.maximumf %6, %7 : vector<8x128xf32>
    %9 = math.absf %6 : vector<8x128xf32>
    %cst_6 = arith.constant 0.000000e+00 : f32
    %10 = vector.broadcast %cst_6 : f32 to vector<8x128xf32>
    %11 = arith.subf %10, %9 : vector<8x128xf32>
    %12 = math.exp %11 : vector<8x128xf32>
    %13 = math.log1p %12 : vector<8x128xf32>
    %14 = arith.addf %8, %13 : vector<8x128xf32>
    %15 = arith.truncf %14 : vector<8x128xf32> to vector<8x128xbf16>
    %c0_7 = arith.constant 0 : index
    %c0_8 = arith.constant 0 : index
    %16 = vector.load %arg4[%c0_7, %c0_8] : memref<128x128xbf16, #tpu.memory_space<vmem>>, vector<128x128xbf16>
    %cst_9 = arith.constant dense<0.000000e+00> : vector<8x128xf32>
    %17 = tpu.matmul %15, %16, %cst_9 {dimension_numbers = #tpu.dot_dimension_numbers<[1], [0], [0], [1], [0, 0, 1, 1], [], []>} : vector<8x128xbf16>, vector<128x128xbf16>, vector<8x128xf32> -> vector<8x128xf32>
    %c0_10 = arith.constant 0 : index
    %c0_11 = arith.constant 0 : index
    %18 = vector.load %arg5[%c0_10, %c0_11] : memref<1x128xf32, #tpu.memory_space<vmem>>, vector<1x128xf32>
    %19 = vector.broadcast %18 : vector<1x128xf32> to vector<8x128xf32>
    %20 = arith.addf %17, %19 : vector<8x128xf32>
    %cst_12 = arith.constant 0.000000e+00 : f32
    %21 = vector.broadcast %cst_12 : f32 to vector<8x128xf32>
    %22 = arith.maximumf %20, %21 : vector<8x128xf32>
    %23 = math.absf %20 : vector<8x128xf32>
    %cst_13 = arith.constant 0.000000e+00 : f32
    %24 = vector.broadcast %cst_13 : f32 to vector<8x128xf32>
    %25 = arith.subf %24, %23 : vector<8x128xf32>
    %26 = math.exp %25 : vector<8x128xf32>
    %27 = math.log1p %26 : vector<8x128xf32>
    %28 = arith.addf %22, %27 : vector<8x128xf32>
    %29 = arith.truncf %28 : vector<8x128xf32> to vector<8x128xbf16>
    %c0_14 = arith.constant 0 : index
    %c0_15 = arith.constant 0 : index
    %30 = vector.load %arg6[%c0_14, %c0_15] : memref<128x128xbf16, #tpu.memory_space<vmem>>, vector<128x128xbf16>
    %cst_16 = arith.constant dense<0.000000e+00> : vector<8x128xf32>
    %31 = tpu.matmul %29, %30, %cst_16 {dimension_numbers = #tpu.dot_dimension_numbers<[1], [0], [0], [1], [0, 0, 1, 1], [], []>} : vector<8x128xbf16>, vector<128x128xbf16>, vector<8x128xf32> -> vector<8x128xf32>
    %c0_17 = arith.constant 0 : index
    %c0_18 = arith.constant 0 : index
    %32 = vector.load %arg7[%c0_17, %c0_18] : memref<1x128xf32, #tpu.memory_space<vmem>>, vector<1x128xf32>
    %33 = vector.broadcast %32 : vector<1x128xf32> to vector<8x128xf32>
    %34 = arith.addf %31, %33 : vector<8x128xf32>
    %c0_19 = arith.constant 0 : index
    %c0_20 = arith.constant 0 : index
    %35 = vector.load %arg8[%c0_19, %c0_20] : memref<8x128xf32, #tpu.memory_space<vmem>>, vector<8x128xf32>
    tpu.vector_store %arg8[%c0_19, %c0_20], %34 {strides = array<i32>} : memref<8x128xf32, #tpu.memory_space<vmem>>, vector<8x128xf32>,
    return
  }
  func.func @transform_0(%arg0: i32) -> (i32, i32) {
    %c0_i32 = arith.constant 0 : i32
    %c0_i32_0 = arith.constant 0 : i32
    return %arg0, %c0_i32 : i32, i32
  }
  func.func @transform_1(%arg0: i32) -> (i32, i32) {
    %c0_i32 = arith.constant 0 : i32
    %c0_i32_0 = arith.constant 0 : i32
    %c0_i32_1 = arith.constant 0 : i32
    return %c0_i32, %c0_i32_0 : i32, i32
  }
  func.func @transform_2(%arg0: i32) -> (i32, i32) {
    %c0_i32 = arith.constant 0 : i32
    %c0_i32_0 = arith.constant 0 : i32
    %c0_i32_1 = arith.constant 0 : i32
    return %c0_i32, %c0_i32_0 : i32, i32
  }
  func.func @transform_3(%arg0: i32) -> (i32, i32) {
    %c0_i32 = arith.constant 0 : i32
    %c0_i32_0 = arith.constant 0 : i32
    %c0_i32_1 = arith.constant 0 : i32
    return %c0_i32, %c0_i32_0 : i32, i32
  }
  func.func @transform_4(%arg0: i32) -> (i32, i32) {
    %c0_i32 = arith.constant 0 : i32
    %c0_i32_0 = arith.constant 0 : i32
    %c0_i32_1 = arith.constant 0 : i32
    return %c0_i32, %c0_i32_0 : i32, i32
  }
  func.func @transform_5(%arg0: i32) -> (i32, i32) {
    %c0_i32 = arith.constant 0 : i32
    %c0_i32_0 = arith.constant 0 : i32
    %c0_i32_1 = arith.constant 0 : i32
    return %c0_i32, %c0_i32_0 : i32, i32
  }
  func.func @transform_6(%arg0: i32) -> (i32, i32) {
    %c0_i32 = arith.constant 0 : i32
    %c0_i32_0 = arith.constant 0 : i32
    %c0_i32_1 = arith.constant 0 : i32
    return %c0_i32, %c0_i32_0 : i32, i32
  }
  func.func @transform_7(%arg0: i32) -> (i32, i32) {
    %c0_i32 = arith.constant 0 : i32
    %c0_i32_0 = arith.constant 0 : i32
    return %arg0, %c0_i32 : i32, i32
  }
}

</mosaic_0001>

<bundles_post_ra>
// kernel: _forward.1
= control target key start
LH: loop header
LB: loop body
LE: loop exit
PB: predicated region body
PF: predicated region fallthrough
CT: control target
= control target key end

     0   :  { %12 = vsyncpa [#allocation3], 0  ;;  %s650_s0 = inlined_call_operand.hbm [shape: f32[8,32], index: 0, kind: input, shape index: {}]   ;;  %s651_s1 = inlined_call_operand.hbm [shape: bf16[32,128], index: 1, kind: input, shape index: {}]   ;;  %s652_s2 = inlined_call_operand.vmem [shape: f32[1,128], index: 2, kind: input, shape index: {}]   ;;  %s653_s3 = inlined_call_operand.hbm [shape: bf16[128,128], index: 3, kind: input, shape index: {}]   ;;  %s654_s4 = inlined_call_operand.vmem [shape: f32[1,128], index: 4, kind: input, shape index: {}]   ;;  %s655_s5 = inlined_call_operand.hbm [shape: bf16[128,128], index: 5, kind: input, shape index: {}]   ;;  %s656_s6 = inlined_call_operand.vmem [shape: f32[1,128], index: 6, kind: input, shape index: {}]   ;;  %s657_s7 = inlined_call_operand.hbm [shape: f32[8,128], index: 7, kind: output, shape index: {}]  }
   0x1   :  { %13 = vsyncpa [#allocation6], 0 }
   0x2   :  { %14 = vsyncpa [#allocation9], 0  ;;  %s31_s26 = sshll.u32 %s651_s1, 4  ;;  %s32_s26 = int_to_ptr.hbm [resolvable:$true] %s31_s26 }
   0x3   :  { %15 = vsyncpa [#allocation4], 0  ;;  %s579_s27 = smov [#allocation5]   ;;  %s21_s8 = sshll.u32 %s650_s0, 4  ;;  %s22_s8 = int_to_ptr.hbm [resolvable:$true] %s21_s8 }
   0x4   :  { %s33_s28 = sshll.u32 %s579_s27, 4  ;;  %s580_s9 = smov 64   ;;  %s34_s28 = int_to_ptr.vmem [resolvable:$true] %s33_s28 }
   0x5   :  { %s581_s10 = smov 4   ;;  %s582_s11 = smov [#allocation2]  }
   0x6   :  { %39 = dma.hbm_to_vmem [thread:$0]  %s32_s26, 256, %s34_s28, [#allocation6], %s580_s9, %s580_s9, %s581_s10  }
   0x7   :  { %s23_s12 = sshll.u32 %s582_s11, 4  ;;  %s46_s15 = sshll.u32 %s653_s3, 4  ;;  %s24_s12 = int_to_ptr.vmem [resolvable:$true] %s23_s12  ;;  %s47_s15 = int_to_ptr.hbm [resolvable:$true] %s46_s15 }
   0x8   :  { %26 = dma.hbm_to_vmem [thread:$0]  %s22_s8, 128, %s24_s12, [#allocation3]  }
   0x9   :  { %s61_s17 = sshll.u32 %s655_s5, 4  ;;  %s583_s18 = smov [#allocation7]   ;;  %s62_s17 = int_to_ptr.hbm [resolvable:$true] %s61_s17 }
   0xa   :  { %s48_s19 = sshll.u32 %s583_s18, 4  ;;  %s584_s0 = smov [#allocation8]   ;;  %s49_s19 = int_to_ptr.vmem [resolvable:$true] %s48_s19 }
   0xb   :  { %54 = dma.hbm_to_vmem [thread:$0]  %s47_s15, 1024, %s49_s19, [#allocation6], %s580_s9, %s580_s9, %s581_s10  }
   0xc   :  { %s63_s20 = sshll.u32 %s584_s0, 4  ;;  %s64_s20 = int_to_ptr.vmem [resolvable:$true] %s63_s20 }
   0xd   :  { %69 = dma.hbm_to_vmem [thread:$0]  %s62_s17, 1024, %s64_s20, [#allocation9], %s580_s9, %s580_s9, %s581_s10  }
   0xe   :  { %571 = dma.done.wait [#allocation3], 128  }
   0xf   :  { %572 = vsyncadd [#allocation3], 4294967168 }
  0x10   :  { %573 = dma.done.wait [#allocation6], 1280  }
  0x11   :  { %574 = vsyncadd [#allocation6], 4294966016 }
  0x12   :  { %575 = dma.done.wait [#allocation9], 1024  }
  0x13   :  { %576 = vsyncadd [#allocation9], 4294966272  ;;  %v416_v0 = vld [vmem:[#allocation5 + $0x8] sm:$0xff]  ;;  %v415_v1 = vld [vmem:[#allocation5] sm:$0xff]  ;;  %vm111_vm0 = vcmask 261120   ;;  %s585_s23 = smov [#allocation10]  }
  0x14   :  { %121 = vmatpush.bf16.msra.mxu0 %v416_v0  ;;  %v89_v2 = vld [vmem:[#allocation2] sm:$0xff]  ;;  %v424_v4 = vld [vmem:[#allocation7 + $0x38] sm:$0xff]  ;;  %v423_v5 = vld [vmem:[#allocation7 + $0x30] sm:$0xff]  ;;  %s328_s24 = sshll.u32 %s585_s23, 4  ;;  %s330_s27 = sshll.u32 %s657_s7, 4  ;;  %s329_s24 = int_to_ptr.vmem [resolvable:$true] %s328_s24  ;;  %s331_s27 = int_to_ptr.hbm [resolvable:$true] %s330_s27 }
  0x15   :  { %v90_v3 = vpack.c.bf16 %v89_v2, %v89_v2  ;;  %212 = vmatpush.bf16.msra.mxu1 %v424_v4  ;;  %v422_v6 = vld [vmem:[#allocation7 + $0x28] sm:$0xff]  ;;  %v421_v7 = vld [vmem:[#allocation7 + $0x20] sm:$0xff]  ;;  %v420_v8 = vld [vmem:[#allocation7 + $0x18] sm:$0xff] }
  0x16   :  { %v419_v9 = vld [vmem:[#allocation7 + $0x10] sm:$0xff]  ;;  %v418_v10 = vld [vmem:[#allocation7 + $0x8] sm:$0xff]  ;;  %v417_v11 = vld [vmem:[#allocation7] sm:$0xff] }
  0x17   :  { %v440_v12 = vld [vmem:[%s652_s2] ss:$0 sm:$0xff]  ;;  %v432_v31 = vld [vmem:[#allocation8 + $0x38] sm:$0xff]  ;;  %v431_v32 = vld [vmem:[#allocation8 + $0x30] sm:$0xff] }
  0x18   :  { %122 = vmatpush.bf16.msra.mxu0 %v415_v1  ;;  %309 = vmatpush.bf16.msra.mxu2 %v432_v31  ;;  %v430_v33 = vld [vmem:[#allocation8 + $0x28] sm:$0xff]  ;;  %v429_v34 = vld [vmem:[#allocation8 + $0x20] sm:$0xff]  ;;  %v428_v35 = vld [vmem:[#allocation8 + $0x18] sm:$0xff] }
  0x19   :  { %213 = vmatpush.bf16.msra.mxu1 %v423_v5  ;;  %v427_v36 = vld [vmem:[#allocation8 + $0x10] sm:$0xff]  ;;  %v426_v37 = vld [vmem:[#allocation8 + $0x8] sm:$0xff]  ;;  %v425_v38 = vld [vmem:[#allocation8] sm:$0xff] }
  0x1a   :  { %v441_v39 = vld [vmem:[%s654_s4] ss:$0 sm:$0xff] }
  0x1b   :  { %350 = vmatmul.msk.bf16.vlgmr.msra.gmra.mxu0 %vm111_vm0, %v90_v3  ;;  %v442_v58 = vld [vmem:[%s656_s6] ss:$0 sm:$0xff] }
  0x1c   :  { %310 = vmatpush.bf16.msra.mxu2 %v431_v32 }
  0x1d   :  { %214 = vmatpush.bf16.msra.mxu1 %v422_v6 }
  0x20   :  { %311 = vmatpush.bf16.msra.mxu2 %v430_v33 }
  0x21   :  { %215 = vmatpush.bf16.msra.mxu1 %v421_v7 }
  0x24   :  { %312 = vmatpush.bf16.msra.mxu2 %v429_v34 }
  0x25   :  { %216 = vmatpush.bf16.msra.mxu1 %v420_v8 }
  0x28   :  { %313 = vmatpush.bf16.msra.mxu2 %v428_v35 }
  0x29   :  { %217 = vmatpush.bf16.msra.mxu1 %v419_v9 }
  0x2c   :  { %314 = vmatpush.bf16.msra.mxu2 %v427_v36 }
  0x2d   :  { %218 = vmatpush.bf16.msra.mxu1 %v418_v10 }
  0x30   :  { %315 = vmatpush.bf16.msra.mxu2 %v426_v37 }
  0x31   :  { %219 = vmatpush.bf16.msra.mxu1 %v417_v11 }
  0x34   :  { %316 = vmatpush.bf16.msra.mxu2 %v425_v38 }
  0x98   :  { %v124_v13 = vpop.f32.mrf.mxu0 }
  0x99   :  { %v125_v14 = vadd.f32 %v440_v12, %v124_v13 }
  0x9b   :  { %v129_v15 = vand.u32 2147483647, %v125_v14  ;;  %v128_v27 = vmax.f32 %v125_v14, 0.0 }
  0x9d   :  { %v130_v16 = vsub.f32 0.0, %v129_v15 }
  0x9f   :  { %v131_v17 = vmul.f32 1.442695, %v130_v16 }
  0xa0   :  { %v126_v18 = vpop.f32.mrf.mxu0 }
  0xa1   :  { %443 = vpow2.f32 %v131_v17 }
  0xa7   :  { %v444_v19 = vpop.eup %443 }
  0xa8   :  { %v133_v20 = vadd.f32 1.0, %v444_v19  ;;  %v136_v21 = vmul.f32 -0.5, %v444_v19  ;;  %v139_v23 = vand.u32 2147483647, %v444_v19 }
  0xaa   :  { %445 = vlog2.f32 %v133_v20  ;;  %v137_v22 = vadd.f32 1.0, %v136_v21  ;;  %vm140_vm1 = vcmp.lt.f32.partialorder %v139_v23, 0.0004427343 }
  0xac   :  { %v138_v26 = vmul.f32 %v444_v19, %v137_v22 }
  0xb0   :  { %v446_v24 = vpop.eup %445 }
  0xb1   :  { %v135_v25 = vmul.f32 0.6931472, %v446_v24 }
  0xb3   :  { %v141_v28 = vsel %vm140_vm1, %v138_v26, %v135_v25 }
  0xb4   :  { %v142_v29 = vadd.f32 %v141_v28, %v128_v27 }
  0xb6   :  { %v143_v30 = vpack.c.bf16 %v142_v29, %v142_v29 }
  0xb8   :  { %220 = vmatmul.bf16.vlgmr.msra.gmra.mxu1 %v143_v30 }
 0x135   :  { %v221_v40 = vpop.f32.mrf.mxu1 }
 0x136   :  { %v222_v41 = vadd.f32 %v441_v39, %v221_v40 }
 0x138   :  { %v226_v42 = vand.u32 2147483647, %v222_v41  ;;  %v225_v54 = vmax.f32 %v222_v41, 0.0 }
 0x13a   :  { %v227_v43 = vsub.f32 0.0, %v226_v42 }
 0x13c   :  { %v228_v44 = vmul.f32 1.442695, %v227_v43 }
 0x13d   :  { %v223_v45 = vpop.f32.mrf.mxu1 }
 0x13e   :  { %447 = vpow2.f32 %v228_v44 }
 0x144   :  { %v448_v46 = vpop.eup %447 }
 0x145   :  { %v230_v47 = vadd.f32 1.0, %v448_v46  ;;  %v233_v48 = vmul.f32 -0.5, %v448_v46  ;;  %v236_v50 = vand.u32 2147483647, %v448_v46 }
 0x147   :  { %449 = vlog2.f32 %v230_v47  ;;  %v234_v49 = vadd.f32 1.0, %v233_v48  ;;  %vm237_vm2 = vcmp.lt.f32.partialorder %v236_v50, 0.0004427343 }
 0x149   :  { %v235_v53 = vmul.f32 %v448_v46, %v234_v49 }
 0x14d   :  { %v450_v51 = vpop.eup %449 }
 0x14e   :  { %v232_v52 = vmul.f32 0.6931472, %v450_v51 }
 0x150   :  { %v238_v55 = vsel %vm237_vm2, %v235_v53, %v232_v52 }
 0x151   :  { %v239_v56 = vadd.f32 %v238_v55, %v225_v54 }
 0x153   :  { %v240_v57 = vpack.c.bf16 %v239_v56, %v239_v56 }
 0x155   :  { %317 = vmatmul.bf16.vlgmr.msra.gmra.mxu2 %v240_v57 }
 0x1d8   :  { %v318_v59 = vpop.f32.mrf.mxu2 }
 0x1d9   :  { %v319_v60 = vadd.f32 %v442_v58, %v318_v59 }
 0x1db   :  { %322 = vst [vmem:[#allocation10] sm:$0xff] %v319_v60 }
 0x1dc   :  { %333 = dma.vmem_to_hbm [thread:$0]  %s329_s24, 128, %s331_s27, [#allocation4]  }
 0x1e0   :  { %v320_v61 = vpop.f32.mrf.mxu2 }
 0x1e1   :  { %577 = dma.done.wait [#allocation4], 128  }
 0x1e2   :  { %578 = vsyncadd [#allocation4], 4294967168 }
 0x1e3   :  { %338 = vsyncpa [#allocation3], 1 }
 0x1e4   :  { %339 = vsyncpa [#allocation6], 1 }
 0x1e5   :  { %340 = vsyncpa [#allocation9], 1 }
 0x1e6   :  { %341 = vsyncpa [#allocation4], 1 }

// kernel: _forward.1
= control target key start
LH: loop header
LB: loop body
LE: loop exit
PB: predicated region body
PF: predicated region fallthrough
CT: control target
= control target key end

     0   :  { %12 = vsyncpa [#allocation3], 0  ;;  %s650_s0 = inlined_call_operand.hbm [shape: f32[8,32], index: 0, kind: input, shape index: {}]   ;;  %s651_s1 = inlined_call_operand.hbm [shape: bf16[32,128], index: 1, kind: input, shape index: {}]   ;;  %s652_s2 = inlined_call_operand.vmem [shape: f32[1,128], index: 2, kind: input, shape index: {}]   ;;  %s653_s3 = inlined_call_operand.hbm [shape: bf16[128,128], index: 3, kind: input, shape index: {}]   ;;  %s654_s4 = inlined_call_operand.vmem [shape: f32[1,128], index: 4, kind: input, shape index: {}]   ;;  %s655_s5 = inlined_call_operand.hbm [shape: bf16[128,128], index: 5, kind: input, shape index: {}]   ;;  %s656_s6 = inlined_call_operand.vmem [shape: f32[1,128], index: 6, kind: input, shape index: {}]   ;;  %s657_s7 = inlined_call_operand.hbm [shape: f32[8,128], index: 7, kind: output, shape index: {}]  }
   0x1   :  { %13 = vsyncpa [#allocation6], 0 }
   0x2   :  { %14 = vsyncpa [#allocation9], 0  ;;  %s31_s26 = sshll.u32 %s651_s1, 4  ;;  %s32_s26 = int_to_ptr.hbm [resolvable:$true] %s31_s26 }
   0x3   :  { %15 = vsyncpa [#allocation4], 0  ;;  %s579_s27 = smov [#allocation5]   ;;  %s21_s8 = sshll.u32 %s650_s0, 4  ;;  %s22_s8 = int_to_ptr.hbm [resolvable:$true] %s21_s8 }
   0x4   :  { %s33_s28 = sshll.u32 %s579_s27, 4  ;;  %s580_s9 = smov 64   ;;  %s34_s28 = int_to_ptr.vmem [resolvable:$true] %s33_s28 }
   0x5   :  { %s581_s10 = smov 4   ;;  %s582_s11 = smov [#allocation2]  }
   0x6   :  { %39 = dma.hbm_to_vmem [thread:$0]  %s32_s26, 256, %s34_s28, [#allocation6], %s580_s9, %s580_s9, %s581_s10  }
   0x7   :  { %s23_s12 = sshll.u32 %s582_s11, 4  ;;  %s46_s15 = sshll.u32 %s653_s3, 4  ;;  %s24_s12 = int_to_ptr.vmem [resolvable:$true] %s23_s12  ;;  %s47_s15 = int_to_ptr.hbm [resolvable:$true] %s46_s15 }
   0x8   :  { %26 = dma.hbm_to_vmem [thread:$0]  %s22_s8, 128, %s24_s12, [#allocation3]  }
   0x9   :  { %s61_s17 = sshll.u32 %s655_s5, 4  ;;  %s583_s18 = smov [#allocation7]   ;;  %s62_s17 = int_to_ptr.hbm [resolvable:$true] %s61_s17 }
   0xa   :  { %s48_s19 = sshll.u32 %s583_s18, 4  ;;  %s584_s0 = smov [#allocation8]   ;;  %s49_s19 = int_to_ptr.vmem [resolvable:$true] %s48_s19 }
   0xb   :  { %54 = dma.hbm_to_vmem [thread:$0]  %s47_s15, 1024, %s49_s19, [#allocation6], %s580_s9, %s580_s9, %s581_s10  }
   0xc   :  { %s63_s20 = sshll.u32 %s584_s0, 4  ;;  %s64_s20 = int_to_ptr.vmem [resolvable:$true] %s63_s20 }
   0xd   :  { %69 = dma.hbm_to_vmem [thread:$0]  %s62_s17, 1024, %s64_s20, [#allocation9], %s580_s9, %s580_s9, %s581_s10  }
   0xe   :  { %571 = dma.done.wait [#allocation3], 128  }
   0xf   :  { %572 = vsyncadd [#allocation3], 4294967168 }
  0x10   :  { %573 = dma.done.wait [#allocation6], 1280  }
  0x11   :  { %574 = vsyncadd [#allocation6], 4294966016 }
  0x12   :  { %575 = dma.done.wait [#allocation9], 1024  }
  0x13   :  { %576 = vsyncadd [#allocation9], 4294966272  ;;  %v416_v0 = vld [vmem:[#allocation5 + $0x8] sm:$0xff]  ;;  %v415_v1 = vld [vmem:[#allocation5] sm:$0xff]  ;;  %vm111_vm0 = vcmask 261120   ;;  %s585_s23 = smov [#allocation10]  }
  0x14   :  { %121 = vmatpush.bf16.msra.mxu0 %v416_v0  ;;  %v89_v2 = vld [vmem:[#allocation2] sm:$0xff]  ;;  %v424_v4 = vld [vmem:[#allocation7 + $0x38] sm:$0xff]  ;;  %v423_v5 = vld [vmem:[#allocation7 + $0x30] sm:$0xff]  ;;  %s328_s24 = sshll.u32 %s585_s23, 4  ;;  %s330_s27 = sshll.u32 %s657_s7, 4  ;;  %s329_s24 = int_to_ptr.vmem [resolvable:$true] %s328_s24  ;;  %s331_s27 = int_to_ptr.hbm [resolvable:$true] %s330_s27 }
  0x15   :  { %v90_v3 = vpack.c.bf16 %v89_v2, %v89_v2  ;;  %212 = vmatpush.bf16.msra.mxu1 %v424_v4  ;;  %v422_v6 = vld [vmem:[#allocation7 + $0x28] sm:$0xff]  ;;  %v421_v7 = vld [vmem:[#allocation7 + $0x20] sm:$0xff]  ;;  %v420_v8 = vld [vmem:[#allocation7 + $0x18] sm:$0xff] }
  0x16   :  { %v419_v9 = vld [vmem:[#allocation7 + $0x10] sm:$0xff]  ;;  %v418_v10 = vld [vmem:[#allocation7 + $0x8] sm:$0xff]  ;;  %v417_v11 = vld [vmem:[#allocation7] sm:$0xff] }
  0x17   :  { %v440_v12 = vld [vmem:[%s652_s2] ss:$0 sm:$0xff]  ;;  %v432_v31 = vld [vmem:[#allocation8 + $0x38] sm:$0xff]  ;;  %v431_v32 = vld [vmem:[#allocation8 + $0x30] sm:$0xff] }
  0x18   :  { %122 = vmatpush.bf16.msra.mxu0 %v415_v1  ;;  %309 = vmatpush.bf16.msra.mxu2 %v432_v31  ;;  %v430_v33 = vld [vmem:[#allocation8 + $0x28] sm:$0xff]  ;;  %v429_v34 = vld [vmem:[#allocation8 + $0x20] sm:$0xff]  ;;  %v428_v35 = vld [vmem:[#allocation8 + $0x18] sm:$0xff] }
  0x19   :  { %213 = vmatpush.bf16.msra.mxu1 %v423_v5  ;;  %v427_v36 = vld [vmem:[#allocation8 + $0x10] sm:$0xff]  ;;  %v426_v37 = vld [vmem:[#allocation8 + $0x8] sm:$0xff]  ;;  %v425_v38 = vld [vmem:[#allocation8] sm:$0xff] }
  0x1a   :  { %v441_v39 = vld [vmem:[%s654_s4] ss:$0 sm:$0xff] }
  0x1b   :  { %350 = vmatmul.msk.bf16.vlgmr.msra.gmra.mxu0 %vm111_vm0, %v90_v3  ;;  %v442_v58 = vld [vmem:[%s656_s6] ss:$0 sm:$0xff] }
  0x1c   :  { %310 = vmatpush.bf16.msra.mxu2 %v431_v32 }
  0x1d   :  { %214 = vmatpush.bf16.msra.mxu1 %v422_v6 }
  0x20   :  { %311 = vmatpush.bf16.msra.mxu2 %v430_v33 }
  0x21   :  { %215 = vmatpush.bf16.msra.mxu1 %v421_v7 }
  0x24   :  { %312 = vmatpush.bf16.msra.mxu2 %v429_v34 }
  0x25   :  { %216 = vmatpush.bf16.msra.mxu1 %v420_v8 }
  0x28   :  { %313 = vmatpush.bf16.msra.mxu2 %v428_v35 }
  0x29   :  { %217 = vmatpush.bf16.msra.mxu1 %v419_v9 }
  0x2c   :  { %314 = vmatpush.bf16.msra.mxu2 %v427_v36 }
  0x2d   :  { %218 = vmatpush.bf16.msra.mxu1 %v418_v10 }
  0x30   :  { %315 = vmatpush.bf16.msra.mxu2 %v426_v37 }
  0x31   :  { %219 = vmatpush.bf16.msra.mxu1 %v417_v11 }
  0x34   :  { %316 = vmatpush.bf16.msra.mxu2 %v425_v38 }
  0x98   :  { %v124_v13 = vpop.f32.mrf.mxu0 }
  0x99   :  { %v125_v14 = vadd.f32 %v440_v12, %v124_v13 }
  0x9b   :  { %v129_v15 = vand.u32 2147483647, %v125_v14  ;;  %v128_v27 = vmax.f32 %v125_v14, 0.0 }
  0x9d   :  { %v130_v16 = vsub.f32 0.0, %v129_v15 }
  0x9f   :  { %v131_v17 = vmul.f32 1.442695, %v130_v16 }
  0xa0   :  { %v126_v18 = vpop.f32.mrf.mxu0 }
  0xa1   :  { %443 = vpow2.f32 %v131_v17 }
  0xa7   :  { %v444_v19 = vpop.eup %443 }
  0xa8   :  { %v133_v20 = vadd.f32 1.0, %v444_v19  ;;  %v136_v21 = vmul.f32 -0.5, %v444_v19  ;;  %v139_v23 = vand.u32 2147483647, %v444_v19 }
  0xaa   :  { %445 = vlog2.f32 %v133_v20  ;;  %v137_v22 = vadd.f32 1.0, %v136_v21  ;;  %vm140_vm1 = vcmp.lt.f32.partialorder %v139_v23, 0.0004427343 }
  0xac   :  { %v138_v26 = vmul.f32 %v444_v19, %v137_v22 }
  0xb0   :  { %v446_v24 = vpop.eup %445 }
  0xb1   :  { %v135_v25 = vmul.f32 0.6931472, %v446_v24 }
  0xb3   :  { %v141_v28 = vsel %vm140_vm1, %v138_v26, %v135_v25 }
  0xb4   :  { %v142_v29 = vadd.f32 %v141_v28, %v128_v27 }
  0xb6   :  { %v143_v30 = vpack.c.bf16 %v142_v29, %v142_v29 }
  0xb8   :  { %220 = vmatmul.bf16.vlgmr.msra.gmra.mxu1 %v143_v30 }
 0x135   :  { %v221_v40 = vpop.f32.mrf.mxu1 }
 0x136   :  { %v222_v41 = vadd.f32 %v441_v39, %v221_v40 }
 0x138   :  { %v226_v42 = vand.u32 2147483647, %v222_v41  ;;  %v225_v54 = vmax.f32 %v222_v41, 0.0 }
 0x13a   :  { %v227_v43 = vsub.f32 0.0, %v226_v42 }
 0x13c   :  { %v228_v44 = vmul.f32 1.442695, %v227_v43 }
 0x13d   :  { %v223_v45 = vpop.f32.mrf.mxu1 }
 0x13e   :  { %447 = vpow2.f32 %v228_v44 }
 0x144   :  { %v448_v46 = vpop.eup %447 }
 0x145   :  { %v230_v47 = vadd.f32 1.0, %v448_v46  ;;  %v233_v48 = vmul.f32 -0.5, %v448_v46  ;;  %v236_v50 = vand.u32 2147483647, %v448_v46 }
 0x147   :  { %449 = vlog2.f32 %v230_v47  ;;  %v234_v49 = vadd.f32 1.0, %v233_v48  ;;  %vm237_vm2 = vcmp.lt.f32.partialorder %v236_v50, 0.0004427343 }
 0x149   :  { %v235_v53 = vmul.f32 %v448_v46, %v234_v49 }
 0x14d   :  { %v450_v51 = vpop.eup %449 }
 0x14e   :  { %v232_v52 = vmul.f32 0.6931472, %v450_v51 }
 0x150   :  { %v238_v55 = vsel %vm237_vm2, %v235_v53, %v232_v52 }
 0x151   :  { %v239_v56 = vadd.f32 %v238_v55, %v225_v54 }
 0x153   :  { %v240_v57 = vpack.c.bf16 %v239_v56, %v239_v56 }
 0x155   :  { %317 = vmatmul.bf16.vlgmr.msra.gmra.mxu2 %v240_v57 }
 0x1d8   :  { %v318_v59 = vpop.f32.mrf.mxu2 }
 0x1d9   :  { %v319_v60 = vadd.f32 %v442_v58, %v318_v59 }
 0x1db   :  { %322 = vst [vmem:[#allocation10] sm:$0xff] %v319_v60 }
 0x1dc   :  { %333 = dma.vmem_to_hbm [thread:$0]  %s329_s24, 128, %s331_s27, [#allocation4]  }
 0x1e0   :  { %v320_v61 = vpop.f32.mrf.mxu2 }
 0x1e1   :  { %577 = dma.done.wait [#allocation4], 128  }
 0x1e2   :  { %578 = vsyncadd [#allocation4], 4294967168 }
 0x1e3   :  { %338 = vsyncpa [#allocation3], 1 }
 0x1e4   :  { %339 = vsyncpa [#allocation6], 1 }
 0x1e5   :  { %340 = vsyncpa [#allocation9], 1 }
 0x1e6   :  { %341 = vsyncpa [#allocation4], 1 }

</bundles_post_ra>
